<compile_context>
chip_gen: v5e
topology: v5e:2x2
jax: 0.10.0
libtpu: 0.0.40
codegen_flags: <defaults>
</compile_context>

<pallas_src>
import functools

import jax
import jax.numpy as jnp
from jax.experimental import pallas as pl
from jax.experimental.pallas import tpu as pltpu


def fc1_kernel(x_ref, w1_ref, b1_ref, w2_ref, b2_ref, w3_ref, b3_ref, o_ref):
    # Feature-major layout: x_ref block is (2, TM) with batch on the lane axis.
    x = x_ref[...]                                              # (2, TM)

    # Layer 1: Linear(2, 64) + ReLU on the MXU (K=2), bias/ReLU fused epilogue.
    h1 = jnp.dot(w1_ref[...], x, preferred_element_type=jnp.float32) + b1_ref[...]
    h1 = jnp.maximum(h1, 0.0)                                   # (64, TM)

    # Layer 2: Linear(64, 32) + ReLU, f32 accumulate.
    h2 = jnp.dot(w2_ref[...], h1, preferred_element_type=jnp.float32) + b2_ref[...]
    h2 = jnp.maximum(h2, 0.0)                                   # (32, TM)

    # Layer 3: Linear(32, 2) -> lane-dense (2, TM) store.
    o_ref[...] = (
        jnp.dot(w3_ref[...], h2, preferred_element_type=jnp.float32) + b3_ref[...]
    ).astype(o_ref.dtype)
    # TODO(synk): optional further tuning — bf16 intermediates / lane-chunked
    # fori_loop to keep h1/h2 vreg-resident at very large TM (kept f32 for
    # exact parity with the PyTorch reference).


def _round_up(n, m):
    return (n + m - 1) // m * m


def _choose_tile(b_pad, block_b):
    # Largest lane tile that amortizes per-step overhead, VMEM-safe on all gens.
    tm = min(_round_up(block_b, 128), b_pad, 32768)
    # Keep >= 2 grid steps when there is enough work so the "parallel" batch
    # axis can shard across v7x's two TensorCores.
    if tm >= b_pad and b_pad >= 256:
        tm = _round_up(b_pad // 2, 128)
    return tm


@functools.partial(jax.jit, static_argnames=("block_b",))
def fc1_forward(x, params, block_b=16384):
    """x: (B, 2) float32. params: PyTorch-layout weights W:(out,in), b:(out,)."""
    w1, b1 = params["w1"], params["b1"]
    w2, b2 = params["w2"], params["b2"]
    w3, b3 = params["w3"], params["b3"]

    B = x.shape[0]
    b_pad = _round_up(B, 128)          # pad only to the lane quantum, not the tile
    tm = _choose_tile(b_pad, block_b)
    grid = pl.cdiv(b_pad, tm)          # last block may be ragged; Pallas masks it

    # Feature-major input (batch on lanes); jnp.pad + .T fuse in XLA.
    x_t = jnp.pad(x, ((0, b_pad - B), (0, 0))).T               # (2, b_pad)

    batch_spec = pl.BlockSpec((2, tm), lambda i: (0, i))

    def resident(shape):
        # Same block index every iteration -> stays resident in VMEM.
        return pl.BlockSpec(shape, lambda i: (0, 0))

    out_t = pl.pallas_call(
        fc1_kernel,
        out_shape=jax.ShapeDtypeStruct((2, b_pad), jnp.float32),
        grid=(grid,),
        in_specs=[
            batch_spec,
            resident((64, 2)), resident((64, 1)),
            resident((32, 64)), resident((32, 1)),
            resident((2, 32)), resident((2, 1)),
        ],
        out_specs=batch_spec,
        compiler_params=pltpu.CompilerParams(
            dimension_semantics=("parallel",),
            vmem_limit_bytes=32 * 1024 * 1024,
        ),
    )(
        x_t,
        w1, b1.reshape(-1, 1),
        w2, b2.reshape(-1, 1),
        w3, b3.reshape(-1, 1),
    )

    return out_t[:, :B].T


def init_params(key):
    """Deterministic init mimicking nn.Linear's U(-1/sqrt(fan_in), 1/sqrt(fan_in)).

    PyTorch layout: W is (out_features, in_features), b is (out_features,).
    """
    dims = [(2, 64), (64, 32), (32, 2)]
    params = {}
    for i, (fan_in, fan_out) in enumerate(dims, start=1):
        key, kw, kb = jax.random.split(key, 3)
        bound = 1.0 / jnp.sqrt(float(fan_in))
        params[f"w{i}"] = jax.random.uniform(
            kw, (fan_out, fan_in), jnp.float32, -bound, bound
        )
        params[f"b{i}"] = jax.random.uniform(
            kb, (fan_out,), jnp.float32, -bound, bound
        )
    return params


def fc1_reference(x, params):
    h = jnp.maximum(x @ params["w1"].T + params["b1"], 0.0)
    h = jnp.maximum(h @ params["w2"].T + params["b2"], 0.0)
    return h @ params["w3"].T + params["b3"]


if __name__ == "__main__":
    key = jax.random.PRNGKey(0)
    key, kx = jax.random.split(key)

    B = 8
    x = jax.random.normal(kx, (B, 2), jnp.float32)
    params = init_params(key)

    out = fc1_forward(x, params)
    out = jax.block_until_ready(out)

    ref = fc1_reference(x, params)
    assert out.shape == (B, 2), out.shape
    assert jnp.allclose(out, ref, atol=1e-4, rtol=1e-4), "mismatch vs reference"

    print("KERNEL_OK")
</pallas_src>

<mosaic_0001>
module attributes {stable_mosaic.version = 11 : i64} {
  func.func @fc1_kernel(%arg0: i32, %arg1: memref<2x128xf32, #tpu.memory_space<vmem>>, %arg2: memref<64x2xf32, #tpu.memory_space<vmem>>, %arg3: memref<64x1xf32, #tpu.memory_space<vmem>>, %arg4: memref<32x64xf32, #tpu.memory_space<vmem>>, %arg5: memref<32x1xf32, #tpu.memory_space<vmem>>, %arg6: memref<2x32xf32, #tpu.memory_space<vmem>>, %arg7: memref<2x1xf32, #tpu.memory_space<vmem>>, %arg8: memref<2x128xf32, #tpu.memory_space<vmem>>) attributes {dimension_semantics = [#tpu.dimension_semantics<parallel>], iteration_bounds = array<i64: 1>, scalar_prefetch = 0 : i64, scratch_operands = 0 : i64, tpu.core_type = #tpu.core_type<tc>, window_params = [{transform_indices = @transform_0, window_bounds = array<i64: 2, 128>}, {pipeline_mode = #tpu.pipeline_mode<synchronous>, transform_indices = @transform_1, window_bounds = array<i64: 64, 2>}, {pipeline_mode = #tpu.pipeline_mode<synchronous>, transform_indices = @transform_2, window_bounds = array<i64: 64, 1>}, {pipeline_mode = #tpu.pipeline_mode<synchronous>, transform_indices = @transform_3, window_bounds = array<i64: 32, 64>}, {pipeline_mode = #tpu.pipeline_mode<synchronous>, transform_indices = @transform_4, window_bounds = array<i64: 32, 1>}, {pipeline_mode = #tpu.pipeline_mode<synchronous>, transform_indices = @transform_5, window_bounds = array<i64: 2, 32>}, {pipeline_mode = #tpu.pipeline_mode<synchronous>, transform_indices = @transform_6, window_bounds = array<i64: 2, 1>}, {transform_indices = @transform_7, window_bounds = array<i64: 2, 128>}]} {
    %c0 = arith.constant 0 : index
    %c0_0 = arith.constant 0 : index
    %0 = vector.load %arg1[%c0, %c0_0] : memref<2x128xf32, #tpu.memory_space<vmem>>, vector<2x128xf32>
    %c0_1 = arith.constant 0 : index
    %c0_2 = arith.constant 0 : index
    %1 = vector.load %arg2[%c0_1, %c0_2] : memref<64x2xf32, #tpu.memory_space<vmem>>, vector<64x2xf32>
    %cst = arith.constant dense<0.000000e+00> : vector<64x128xf32>
    %2 = tpu.matmul %1, %0, %cst {dimension_numbers = #tpu.dot_dimension_numbers<[1], [0], [0], [1], [0, 0, 1, 1], [], []>} : vector<64x2xf32>, vector<2x128xf32>, vector<64x128xf32> -> vector<64x128xf32>
    %c0_3 = arith.constant 0 : index
    %c0_4 = arith.constant 0 : index
    %3 = vector.load %arg3[%c0_3, %c0_4] : memref<64x1xf32, #tpu.memory_space<vmem>>, vector<64x1xf32>
    %4 = vector.broadcast %3 : vector<64x1xf32> to vector<64x128xf32>
    %5 = arith.addf %2, %4 : vector<64x128xf32>
    %cst_5 = arith.constant 0.000000e+00 : f32
    %6 = vector.broadcast %cst_5 : f32 to vector<64x128xf32>
    %7 = arith.maximumf %5, %6 : vector<64x128xf32>
    %c0_6 = arith.constant 0 : index
    %c0_7 = arith.constant 0 : index
    %8 = vector.load %arg4[%c0_6, %c0_7] : memref<32x64xf32, #tpu.memory_space<vmem>>, vector<32x64xf32>
    %cst_8 = arith.constant dense<0.000000e+00> : vector<32x128xf32>
    %9 = tpu.matmul %8, %7, %cst_8 {dimension_numbers = #tpu.dot_dimension_numbers<[1], [0], [0], [1], [0, 0, 1, 1], [], []>} : vector<32x64xf32>, vector<64x128xf32>, vector<32x128xf32> -> vector<32x128xf32>
    %c0_9 = arith.constant 0 : index
    %c0_10 = arith.constant 0 : index
    %10 = vector.load %arg5[%c0_9, %c0_10] : memref<32x1xf32, #tpu.memory_space<vmem>>, vector<32x1xf32>
    %11 = vector.broadcast %10 : vector<32x1xf32> to vector<32x128xf32>
    %12 = arith.addf %9, %11 : vector<32x128xf32>
    %cst_11 = arith.constant 0.000000e+00 : f32
    %13 = vector.broadcast %cst_11 : f32 to vector<32x128xf32>
    %14 = arith.maximumf %12, %13 : vector<32x128xf32>
    %c0_12 = arith.constant 0 : index
    %c0_13 = arith.constant 0 : index
    %15 = vector.load %arg6[%c0_12, %c0_13] : memref<2x32xf32, #tpu.memory_space<vmem>>, vector<2x32xf32>
    %cst_14 = arith.constant dense<0.000000e+00> : vector<2x128xf32>
    %16 = tpu.matmul %15, %14, %cst_14 {dimension_numbers = #tpu.dot_dimension_numbers<[1], [0], [0], [1], [0, 0, 1, 1], [], []>} : vector<2x32xf32>, vector<32x128xf32>, vector<2x128xf32> -> vector<2x128xf32>
    %c0_15 = arith.constant 0 : index
    %c0_16 = arith.constant 0 : index
    %17 = vector.load %arg7[%c0_15, %c0_16] : memref<2x1xf32, #tpu.memory_space<vmem>>, vector<2x1xf32>
    %18 = vector.broadcast %17 : vector<2x1xf32> to vector<2x128xf32>
    %19 = arith.addf %16, %18 : vector<2x128xf32>
    %c0_17 = arith.constant 0 : index
    %c0_18 = arith.constant 0 : index
    %20 = vector.load %arg8[%c0_17, %c0_18] : memref<2x128xf32, #tpu.memory_space<vmem>>, vector<2x128xf32>
    tpu.vector_store %arg8[%c0_17, %c0_18], %19 {strides = array<i32>} : memref<2x128xf32, #tpu.memory_space<vmem>>, vector<2x128xf32>,
    return
  }
  func.func @transform_0(%arg0: i32) -> (i32, i32) {
    %c0_i32 = arith.constant 0 : i32
    %c0_i32_0 = arith.constant 0 : i32
    return %c0_i32, %arg0 : i32, i32
  }
  func.func @transform_1(%arg0: i32) -> (i32, i32) {
    %c0_i32 = arith.constant 0 : i32
    %c0_i32_0 = arith.constant 0 : i32
    %c0_i32_1 = arith.constant 0 : i32
    return %c0_i32, %c0_i32_0 : i32, i32
  }
  func.func @transform_2(%arg0: i32) -> (i32, i32) {
    %c0_i32 = arith.constant 0 : i32
    %c0_i32_0 = arith.constant 0 : i32
    %c0_i32_1 = arith.constant 0 : i32
    return %c0_i32, %c0_i32_0 : i32, i32
  }
  func.func @transform_3(%arg0: i32) -> (i32, i32) {
    %c0_i32 = arith.constant 0 : i32
    %c0_i32_0 = arith.constant 0 : i32
    %c0_i32_1 = arith.constant 0 : i32
    return %c0_i32, %c0_i32_0 : i32, i32
  }
  func.func @transform_4(%arg0: i32) -> (i32, i32) {
    %c0_i32 = arith.constant 0 : i32
    %c0_i32_0 = arith.constant 0 : i32
    %c0_i32_1 = arith.constant 0 : i32
    return %c0_i32, %c0_i32_0 : i32, i32
  }
  func.func @transform_5(%arg0: i32) -> (i32, i32) {
    %c0_i32 = arith.constant 0 : i32
    %c0_i32_0 = arith.constant 0 : i32
    %c0_i32_1 = arith.constant 0 : i32
    return %c0_i32, %c0_i32_0 : i32, i32
  }
  func.func @transform_6(%arg0: i32) -> (i32, i32) {
    %c0_i32 = arith.constant 0 : i32
    %c0_i32_0 = arith.constant 0 : i32
    %c0_i32_1 = arith.constant 0 : i32
    return %c0_i32, %c0_i32_0 : i32, i32
  }
  func.func @transform_7(%arg0: i32) -> (i32, i32) {
    %c0_i32 = arith.constant 0 : i32
    %c0_i32_0 = arith.constant 0 : i32
    return %c0_i32, %arg0 : i32, i32
  }
}

</mosaic_0001>

<bundles_post_ra>
// kernel: fc1_forward.1
= control target key start
LH: loop header
LB: loop body
LE: loop exit
PB: predicated region body
PF: predicated region fallthrough
CT: control target
= control target key end

     0   :  { %vm108_vm0 = vcmask 1041408   ;;  %vm83_vm1 = vcmask 15360   ;;  %v298_v2 = vmov 0   ;;  %vm189_vm2 = vcmask 523264   ;;  %s431_s0 = inlined_call_operand.vmem [shape: f32[2,128], index: 0, kind: input, shape index: {}]   ;;  %s432_s1 = inlined_call_operand.vmem [shape: f32[64,2], index: 1, kind: input, shape index: {}]   ;;  %s433_s2 = inlined_call_operand.vmem [shape: f32[64,1], index: 2, kind: input, shape index: {}]   ;;  %s434_s4 = inlined_call_operand.vmem [shape: f32[32,1], index: 4, kind: input, shape index: {}]   ;;  %s435_s6 = inlined_call_operand.vmem [shape: f32[2,1], index: 6, kind: input, shape index: {}]   ;;  %s436_s3 = inlined_call_operand.vmem [shape: f32[32,64], index: 3, kind: input, shape index: {}]   ;;  %s437_s5 = inlined_call_operand.vmem [shape: f32[2,32], index: 5, kind: input, shape index: {}]   ;;  %s438_s7 = inlined_call_operand.vmem [shape: f32[2,128], index: 7, kind: output, shape index: {}]  }
   0x1   :  { %v26_v0 = vld [vmem:[%s431_s0] sm:$0x3]  ;;  %295 = vset.pattern.permute.xlu0 %v298_v2  ;;  %v42_v3 = vld [vmem:[%s433_s2 + $0x38] sm:$0xff]  ;;  %296 = vset.pattern.permute.xlu1 %v298_v2  ;;  %v40_v5 = vld [vmem:[%s433_s2 + $0x28] sm:$0xff]  ;;  %vm242_vm3 = vcmask 261120  }
   0x2   :  { %v31_v1 = vld [vmem:[%s432_s1 + $0x20] sm:$0xff]  ;;  %285 = vmatpush.msk.msra.mxu3 %vm108_vm0, %v26_v0  ;;  %80 = vperm.xlu0 %295, %v42_v3   ;;  %v41_v6 = vld [vmem:[%s433_s2 + $0x30] sm:$0xff]  ;;  %v38_v7 = vld [vmem:[%s433_s2 + $0x18] sm:$0xff] }
   0x3   :  { %v27_v4 = vld [vmem:[%s432_s1] sm:$0xff]  ;;  %276 = vmatmul.msk.f32.vlgmr.msra.gmra.mxu3 %vm83_vm1, %v31_v1  ;;  %271 = vmatpush.msk.msra.mxu0 %vm108_vm0, %v26_v0  ;;  %v32_v8 = vld [vmem:[%s432_s1 + $0x28] sm:$0xff]  ;;  %v37_v11 = vld [vmem:[%s433_s2 + $0x10] sm:$0xff] }
   0x4   :  { %272 = vmatmul.msk.f32.vlgmr.msra.gmra.mxu0 %vm83_vm1, %v27_v4  ;;  %70 = vperm.xlu1 %296, %v40_v5   ;;  %v28_v9 = vld [vmem:[%s432_s1 + $0x8] sm:$0xff]  ;;  %v39_v10 = vld [vmem:[%s433_s2 + $0x20] sm:$0xff]  ;;  %v33_v13 = vld [vmem:[%s432_s1 + $0x30] sm:$0xff] }
   0x5   :  { %297 = vset.pattern.permute.xlu2 %v298_v2  ;;  %v36_v12 = vld [vmem:[%s433_s2 + $0x8] sm:$0xff]  ;;  %v29_v14 = vld [vmem:[%s432_s1 + $0x10] sm:$0xff]  ;;  %v35_v15 = vld [vmem:[%s433_s2] sm:$0xff] }
   0x6   :  { %60 = vperm.xlu2 %297, %v38_v7   ;;  %v168_v16 = vld [vmem:[%s434_s4 + $0x18] sm:$0xff]  ;;  %v167_v17 = vld [vmem:[%s434_s4 + $0x10] sm:$0xff]  ;;  %v166_v20 = vld [vmem:[%s434_s4 + $0x8] sm:$0xff] }
   0x7   :  { %v34_v18 = vld [vmem:[%s432_s1 + $0x38] sm:$0xff]  ;;  %v165_v21 = vld [vmem:[%s434_s4] sm:$0xff]  ;;  %v162_v57 = vld [vmem:[%s436_s3 + $0x8] sm:$0xff] }
   0x8   :  { %v30_v19 = vld [vmem:[%s432_s1 + $0x18] sm:$0xff]  ;;  %v236_v22 = vld [vmem:[%s435_s6] sm:$0x3]  ;;  %v163_v58 = vld [vmem:[%s436_s3 + $0x10] sm:$0xff] }
   0x9   :  { %v161_v55 = vld [vmem:[%s436_s3] sm:$0xff]  ;;  %v164_v56 = vld [vmem:[%s436_s3 + $0x18] sm:$0xff] }
   0xa   :  { %75 = vperm.xlu0 %295, %v41_v6  }
   0xb   :  { %277 = vmatmul.msk.f32.gmra.mxu3 %vm83_vm1, %v32_v8 }
   0xc   :  { %273 = vmatmul.msk.f32.gmra.mxu0 %vm83_vm1, %v28_v9  ;;  %65 = vperm.xlu1 %296, %v39_v10  }
   0xe   :  { %55 = vperm.xlu2 %297, %v37_v11   ;;  %v235_v11 = vld [vmem:[%s437_s5] sm:$0x3] }
  0x12   :  { %50 = vperm.xlu0 %295, %v36_v12  }
  0x13   :  { %278 = vmatmul.msk.f32.gmra.mxu3 %vm83_vm1, %v33_v13 }
  0x14   :  { %274 = vmatmul.msk.f32.gmra.mxu0 %vm83_vm1, %v29_v14  ;;  %45 = vperm.xlu1 %296, %v35_v15  }
  0x16   :  { %186 = vperm.xlu2 %297, %v168_v16  }
  0x1a   :  { %181 = vperm.xlu0 %295, %v167_v17  }
  0x1b   :  { %279 = vmatmul.msk.f32.gmra.mxu3 %vm83_vm1, %v34_v18 }
  0x1c   :  { %275 = vmatmul.msk.f32.gmra.mxu0 %vm83_vm1, %v30_v19  ;;  %176 = vperm.xlu1 %296, %v166_v20  }
  0x1e   :  { %171 = vperm.xlu2 %297, %v165_v21  }
  0x22   :  { %239 = vperm.xlu0 %295, %v236_v22  }
  0x60   :  { %v61_v31 = vpop.permute.xlu2 %60 }
  0x68   :  { %v56_v44 = vpop.permute.xlu2 %55 }
  0x70   :  { %v187_v60 = vpop.permute.xlu2 %186 }
  0x74   :  { %v81_v27 = vpop.permute.xlu0 %80 }
  0x76   :  { %v71_v28 = vpop.permute.xlu1 %70 }
  0x78   :  { %v172_v6 = vpop.permute.xlu2 %171 }
  0x7c   :  { %v76_v32 = vpop.permute.xlu0 %75 }
  0x7e   :  { %v66_v33 = vpop.permute.xlu1 %65 }
  0x81   :  { %v129_v23 = vpop.f32.mrf.mxu0 }
  0x84   :  { %v51_v47 = vpop.permute.xlu0 %50 }
  0x86   :  { %v141_v24 = vpop.f32.mrf.mxu3  ;;  %v46_v48 = vpop.permute.xlu1 %45 }
  0x87   :  { %v142_v40 = vadd.f32 %v141_v24, %v66_v33  ;;  %v130_v51 = vadd.f32 %v129_v23, %v46_v48 }
  0x89   :  { %v132_v26 = vpop.f32.mrf.mxu0  ;;  %v157_v45 = vmax.f32 %v142_v40, 0.0  ;;  %v153_v54 = vmax.f32 %v130_v51, 0.0 }
  0x8a   :  { %v133_v49 = vadd.f32 %v132_v26, %v51_v47 }
  0x8c   :  { %v154_v53 = vmax.f32 %v133_v49, 0.0  ;;  %v182_v1 = vpop.permute.xlu0 %181 }
  0x8e   :  { %v144_v25 = vpop.f32.mrf.mxu3  ;;  %v177_v2 = vpop.permute.xlu1 %176 }
  0x8f   :  { %v145_v37 = vadd.f32 %v144_v25, %v71_v28 }
  0x91   :  { %v135_v30 = vpop.f32.mrf.mxu0  ;;  %v158_v42 = vmax.f32 %v145_v37, 0.0 }
  0x92   :  { %v136_v46 = vadd.f32 %v135_v30, %v56_v44 }
  0x94   :  { %v155_v52 = vmax.f32 %v136_v46, 0.0  ;;  %v240_v12 = vpop.permute.xlu0 %239 }
  0x96   :  { %v147_v29 = vpop.f32.mrf.mxu3 }
  0x97   :  { %v148_v35 = vadd.f32 %v147_v29, %v76_v32 }
  0x99   :  { %v138_v39 = vpop.f32.mrf.mxu0  ;;  %v159_v41 = vmax.f32 %v148_v35, 0.0 }
  0x9a   :  { %v139_v43 = vadd.f32 %v138_v39, %v61_v31 }
  0x9c   :  { %v156_v50 = vmax.f32 %v139_v43, 0.0 }
  0x9e   :  { %v150_v34 = vpop.f32.mrf.mxu3 }
  0x9f   :  { %v151_v36 = vadd.f32 %v150_v34, %v81_v27 }
  0xa1   :  { %v160_v38 = vmax.f32 %v151_v36, 0.0 }
  0xa3   :  { %210 = vmatpush.msra.mxu1 %v160_v38  ;;  %286 = vmatpush.msra.mxu2 %v160_v38 }
  0xa5   :  { %211 = vmatpush.msra.mxu1 %v159_v41  ;;  %287 = vmatpush.msra.mxu2 %v159_v41 }
  0xa7   :  { %212 = vmatpush.msra.mxu1 %v158_v42  ;;  %288 = vmatpush.msra.mxu2 %v158_v42 }
  0xa9   :  { %213 = vmatpush.msra.mxu1 %v157_v45  ;;  %289 = vmatpush.msra.mxu2 %v157_v45 }
  0xab   :  { %214 = vmatpush.msra.mxu1 %v156_v50  ;;  %290 = vmatpush.msra.mxu2 %v156_v50 }
  0xad   :  { %215 = vmatpush.msra.mxu1 %v155_v52  ;;  %291 = vmatpush.msra.mxu2 %v155_v52 }
  0xaf   :  { %216 = vmatpush.msra.mxu1 %v154_v53  ;;  %292 = vmatpush.msra.mxu2 %v154_v53 }
  0xb1   :  { %217 = vmatpush.msra.mxu1 %v153_v54  ;;  %293 = vmatpush.msra.mxu2 %v153_v54 }
  0xb2   :  { %280 = vmatmul.msk.f32.vlgmr.msra.gmra.mxu1 %vm189_vm2, %v161_v55  ;;  %283 = vmatmul.msk.f32.vlgmr.msra.gmra.mxu2 %vm189_vm2, %v164_v56 }
  0xba   :  { %281 = vmatmul.msk.f32.gmra.mxu1 %vm189_vm2, %v162_v57 }
  0xc2   :  { %282 = vmatmul.msk.f32.gmra.mxu1 %vm189_vm2, %v163_v58 }
 0x12f   :  { %v219_v59 = vpop.f32.mrf.mxu1 }
 0x130   :  { %v220_v7 = vadd.f32 %v219_v59, %v172_v6 }
 0x132   :  { %v231_v10 = vmax.f32 %v220_v7, 0.0 }
 0x135   :  { %v228_v61 = vpop.f32.mrf.mxu2 }
 0x136   :  { %v229_v62 = vadd.f32 %v228_v61, %v187_v60 }
 0x137   :  { %v222_v63 = vpop.f32.mrf.mxu1 }
 0x138   :  { %v234_v0 = vmax.f32 %v229_v62, 0.0  ;;  %v223_v4 = vadd.f32 %v222_v63, %v177_v2 }
 0x13a   :  { %258 = vmatpush.msrb.mxu2 %v234_v0  ;;  %v232_v9 = vmax.f32 %v223_v4, 0.0 }
 0x13f   :  { %v225_v3 = vpop.f32.mrf.mxu1 }
 0x140   :  { %v226_v5 = vadd.f32 %v225_v3, %v182_v1 }
 0x142   :  { %v233_v8 = vmax.f32 %v226_v5, 0.0 }
 0x144   :  { %259 = vmatpush.msrb.mxu2 %v233_v8 }
 0x146   :  { %260 = vmatpush.msrb.mxu2 %v232_v9 }
 0x148   :  { %261 = vmatpush.msrb.mxu2 %v231_v10 }
 0x149   :  { %284 = vmatmul.msk.f32.vlgmr.msrb.gmra.mxu2 %vm242_vm3, %v235_v11 }
 0x1cc   :  { %v263_v13 = vpop.f32.mrf.mxu2 }
 0x1cd   :  { %v264_v14 = vadd.f32 %v263_v13, %v240_v12 }
 0x1cf   :  { %266 = vst [vmem:[%s438_s7] sm:$0x3] %v264_v14 }

</bundles_post_ra>
